<compile_context>
chip_gen: v7x
topology: tpu7x:2x2x1
jax: 0.10.0
libtpu: 0.0.40
codegen_flags: <defaults>
</compile_context>

<pallas_src>
import jax
import jax.numpy as jnp
from jax.experimental import pallas as pl
from jax.experimental.pallas import tpu as pltpu

_LANE = 128


def _round_up(x: int, m: int) -> int:
    return ((x + m - 1) // m) * m


def _cdiv(a: int, b: int) -> int:
    return -(-a // b)


def _make_kernel(apply_threshold: bool, tile_cols: int, steps_per_split: int):
    """Per-group masked sums + member counts over N tiles (one split per TC)."""

    def kernel(nvalid_ref, thr_ref, pred_ref, sens_ref, sums_ref, cnts_ref):
        c = pl.program_id(0)          # split index (parallel -> one per TC on v7x)
        k = pl.program_id(1)          # tile index within the split (reduction)

        @pl.when(k == 0)
        def _init():
            sums_ref[...] = jnp.zeros_like(sums_ref)
            cnts_ref[...] = jnp.zeros_like(cnts_ref)

        # Global (unclamped) column index of every lane in this tile. Lanes past
        # the true N (partial last tile, or phantom tiles of an uneven split)
        # contribute exactly zero.
        base = (c * steps_per_split + k) * tile_cols
        col = base + jax.lax.broadcasted_iota(jnp.int32, (1, tile_cols), 1)
        valid = col < nvalid_ref[0]

        # bf16 -> f32 before any arithmetic (no bf16 VPU on v5e). where() (not
        # multiply-by-mask) so unspecified OOB bytes (possibly NaN) are dropped.
        sens = jnp.where(valid, sens_ref[...].astype(jnp.float32), 0.0)   # (G, T)
        pred = pred_ref[...]                                              # (1, T) f32
        if apply_threshold:
            pred = (pred >= thr_ref[0]).astype(jnp.float32)
        pred = jnp.where(valid, pred, 0.0)

        part_s = jnp.sum(sens * pred, axis=1, keepdims=True)              # (G, 1)
        part_c = jnp.sum(sens, axis=1, keepdims=True)                     # (G, 1)
        sums_ref[...] += part_s[None]                                      # (1, G, 1)
        cnts_ref[...] += part_c[None]

    return kernel


def _group_sums_counts(pred: jax.Array, sens_t: jax.Array, threshold,
                       *, tile_cols=None):
    """pred: (N,), sens_t: (G, N) bf16. Returns (sums (G,), counts (G,)) f32."""
    N = pred.shape[0]
    G = sens_t.shape[0]
    apply_threshold = threshold is not None

    if tile_cols is None:
        # VMEM budget for the double-buffered input blocks, accounting for the
        # sublane padding of small-G blocks:
        #   sens : (G, T) bf16 -> rows pad to 16 (bf16 sublane packing)
        #   pred : (1, T) f32  -> rows pad to 8
        sens_rows = _round_up(max(G, 1), 16)
        per_lane_bytes = 2 * (sens_rows * 2 + 8 * 4)          # x2: double buffering
        budget = 12 * 1024 * 1024
        tile_cols = max(_LANE, (budget // per_lane_bytes) // _LANE * _LANE)
    tile_cols = min(tile_cols, _round_up(N, _LANE))

    total_steps = _cdiv(N, tile_cols)
    num_splits = 2 if total_steps >= 2 else 1          # v7x: one half per TensorCore
    steps_per_split = _cdiv(total_steps, num_splits)

    def col_block(c, k):
        # Clamp so phantom trailing steps of an uneven split re-read the last
        # real block; their contribution is masked to zero inside the kernel.
        return jnp.minimum(c * steps_per_split + k, total_steps - 1)

    nvalid = jnp.full((1,), N, dtype=jnp.int32)
    thr = jnp.full((1,), threshold if apply_threshold else 0.0, dtype=jnp.float32)
    pred_row = pred.astype(jnp.float32).reshape(1, N)

    cost = pl.CostEstimate(
        flops=3 * G * N,
        transcendentals=0,
        bytes_accessed=N * (2 * G + 4) + 2 * num_splits * G * 4,
    )

    sums, cnts = pl.pallas_call(
        _make_kernel(apply_threshold, tile_cols, steps_per_split),
        out_shape=(jax.ShapeDtypeStruct((num_splits, G, 1), jnp.float32),
                   jax.ShapeDtypeStruct((num_splits, G, 1), jnp.float32)),
        grid=(num_splits, steps_per_split),
        in_specs=[
            pl.BlockSpec(memory_space=pltpu.MemorySpace.SMEM),   # true N
            pl.BlockSpec(memory_space=pltpu.MemorySpace.SMEM),   # threshold scalar
            pl.BlockSpec((1, tile_cols), lambda c, k: (0, col_block(c, k))),  # pred
            pl.BlockSpec((G, tile_cols), lambda c, k: (0, col_block(c, k))),  # sens^T bf16
        ],
        out_specs=(
            pl.BlockSpec((1, G, 1), lambda c, k: (c, 0, 0)),     # per-split accumulators
            pl.BlockSpec((1, G, 1), lambda c, k: (c, 0, 0)),
        ),
        compiler_params=pltpu.CompilerParams(
            dimension_semantics=("parallel", "arbitrary"),
            vmem_limit_bytes=32 * 1024 * 1024),
        cost_estimate=cost,
    )(nvalid, thr, pred_row, sens_t)

    return jnp.sum(sums, axis=0)[:, 0], jnp.sum(cnts, axis=0)[:, 0]


def _validate_shape(x: jax.Array) -> jax.Array:
    """Mirror of torch_fairness _validate_shape(..., squeeze=True)."""
    if x.ndim > 2:
        raise ValueError("pred must be 1-D or (N, 1)")
    if x.ndim == 2:
        if x.shape[1] != 1:
            raise ValueError("pred must be 1-D or (N, 1)")
        x = x[:, 0]
    return x


def demographic_parity(pred, sensitive, majority_minority_pairs, threshold=None,
                       *, tile_cols=None):
    """Full DemographicParity.forward."""
    pred = _validate_shape(jnp.asarray(pred))
    # Single pass over `sensitive`: cast to bf16 (0/1 exact) + transpose to the
    # lane-dense (G, N) layout the kernel consumes.
    # TODO(synk): cache sens_t (and the threshold-independent counts) across
    # threshold sweeps, and batch multiple thresholds into one kernel pass.
    sens_t = jnp.asarray(sensitive).astype(jnp.bfloat16).T            # (G, N)
    sums, cnts = _group_sums_counts(pred, sens_t, threshold, tile_cols=tile_cols)
    rates = sums / cnts                                                # per-group rate

    out = []
    for maj_idx, min_groups in majority_minority_pairs:
        maj_rate = rates[maj_idx]
        for min_idx in min_groups:
            out.append(jnp.abs(rates[min_idx] - maj_rate))
    return jnp.stack(out)


class SensitiveMap:
    """Minimal stand-in: holds ((majority_idx, (minority_idx, ...)), ...)."""

    def __init__(self, majority_minority_pairs):
        self.majority_minority_pairs = tuple(majority_minority_pairs)


class DemographicParity:
    def __init__(self, threshold=None, sensitive_map=None):
        self.threshold = threshold
        self.sensitive_map = sensitive_map

    def __call__(self, pred, sensitive):
        return demographic_parity(pred, sensitive,
                                  self.sensitive_map.majority_minority_pairs,
                                  self.threshold)


def _reference(pred, sensitive, pairs, threshold):
    """Pure-JAX reference matching the PyTorch forward."""
    p = pred
    if threshold is not None:
        p = (p >= threshold).astype(jnp.float32)
    res = []
    for maj_idx, min_groups in pairs:
        maj_m = sensitive[:, maj_idx]
        maj_rate = jnp.sum(p * maj_m) / jnp.sum(maj_m)
        for min_idx in min_groups:
            m = sensitive[:, min_idx]
            rate = jnp.sum(p * m) / jnp.sum(m)
            res.append(jnp.abs(rate - maj_rate))
    return jnp.stack(res)


if __name__ == "__main__":
    # 1) Docstring example from the PyTorch module (expected value: 0.5).
    sens_doc = jnp.array([[1., 0.], [1., 0.], [0., 1.], [0., 1.]], jnp.float32)
    pred_doc = jnp.array([0.7, 0.6, 0.6, 0.2], jnp.float32)
    dp_doc = DemographicParity(threshold=0.5, sensitive_map=SensitiveMap(((0, (1,)),)))
    out_doc = jax.block_until_ready(dp_doc(pred_doc, sens_doc))
    assert out_doc.shape == (1,)
    assert jnp.allclose(out_doc, jnp.array([0.5], jnp.float32), atol=1e-6), out_doc

    # 2) Deterministic random inputs (PRNGKey(0)), N not a multiple of 128 to
    #    exercise partial-tile masking; (N, 1) pred exercises _validate_shape.
    key = jax.random.PRNGKey(0)
    k1, k2, k3 = jax.random.split(key, 3)
    N = 200
    pred = jax.random.uniform(k1, (N, 1), dtype=jnp.float32)
    a = jax.random.bernoulli(k2, 0.5, (N,)).astype(jnp.float32)
    b = jax.random.bernoulli(k3, 0.5, (N,)).astype(jnp.float32)
    sensitive = jnp.stack([1.0 - a, a, 1.0 - b, b], axis=1)        # (N, 4) dummy-coded
    pairs = ((0, (1,)), (2, (3,)))

    dp = DemographicParity(threshold=0.5, sensitive_map=SensitiveMap(pairs))
    out = jax.block_until_ready(dp(pred, sensitive))
    ref = _reference(pred[:, 0], sensitive, pairs, 0.5)
    assert out.shape == (2,)
    assert jnp.allclose(out, ref, atol=1e-5), (out, ref)

    # 3) threshold=None passthrough path.
    dp_none = DemographicParity(threshold=None, sensitive_map=SensitiveMap(pairs))
    out_none = jax.block_until_ready(dp_none(pred, sensitive))
    ref_none = _reference(pred[:, 0], sensitive, pairs, None)
    assert jnp.allclose(out_none, ref_none, atol=1e-5), (out_none, ref_none)

    # 4) Forced tiny tiles: multi-tile grid, 2-way split, partial last tile.
    N4 = 500
    k4, k5, k6 = jax.random.split(jax.random.PRNGKey(1), 3)
    pred4 = jax.random.uniform(k4, (N4,), dtype=jnp.float32)
    a4 = jax.random.bernoulli(k5, 0.4, (N4,)).astype(jnp.float32)
    b4 = jax.random.bernoulli(k6, 0.6, (N4,)).astype(jnp.float32)
    sens4 = jnp.stack([1.0 - a4, a4, 1.0 - b4, b4], axis=1)
    out4 = jax.block_until_ready(
        demographic_parity(pred4, sens4, pairs, threshold=0.5, tile_cols=128))
    ref4 = _reference(pred4, sens4, pairs, 0.5)
    assert jnp.allclose(out4, ref4, atol=1e-5), (out4, ref4)

    # 5) Odd tile count: the phantom (fully-masked, clamped) trailing step of an
    #    uneven 2-way split must contribute zero.
    N5 = 300
    pred5 = pred4[:N5]
    sens5 = sens4[:N5]
    out5 = jax.block_until_ready(
        demographic_parity(pred5, sens5, pairs, threshold=None, tile_cols=128))
    ref5 = _reference(pred5, sens5, pairs, None)
    assert jnp.allclose(out5, ref5, atol=1e-5), (out5, ref5)

    print("KERNEL_OK")
</pallas_src>

<mosaic_0001>
module attributes {stable_mosaic.version = 11 : i64} {
  func.func @kernel(%arg0: i32, %arg1: i32, %arg2: memref<1xi32, #tpu.memory_space<smem>>, %arg3: memref<1xf32, #tpu.memory_space<smem>>, %arg4: memref<1x128xf32, #tpu.memory_space<vmem>>, %arg5: memref<2x128xbf16, #tpu.memory_space<vmem>>, %arg6: memref<1x2x1xf32, #tpu.memory_space<vmem>>, %arg7: memref<1x2x1xf32, #tpu.memory_space<vmem>>) attributes {dimension_semantics = [#tpu.dimension_semantics<parallel>, #tpu.dimension_semantics<arbitrary>], iteration_bounds = array<i64: 1, 1>, scalar_prefetch = 0 : i64, scratch_operands = 0 : i64, tpu.core_type = #tpu.core_type<tc>, window_params = [{transform_indices = @transform_0, window_bounds = array<i64: 1>}, {transform_indices = @transform_1, window_bounds = array<i64: 1>}, {transform_indices = @transform_2, window_bounds = array<i64: 1, 128>}, {transform_indices = @transform_3, window_bounds = array<i64: 2, 128>}, {transform_indices = @transform_4, window_bounds = array<i64: 1, 2, 1>}, {transform_indices = @transform_5, window_bounds = array<i64: 1, 2, 1>}]} {
    %c0_i32 = arith.constant 0 : i32
    %0 = arith.cmpi eq, %arg1, %c0_i32 : i32
    %1 = arith.extui %0 : i1 to i32
    %c0_i32_0 = arith.constant 0 : i32
    %2 = arith.cmpi ne, %1, %c0_i32_0 : i32
    scf.if %2 {
      %cst_21 = arith.constant 0.000000e+00 : f32
      %40 = vector.broadcast %cst_21 : f32 to vector<1x2x1xf32>
      %c0_22 = arith.constant 0 : index
      %c0_23 = arith.constant 0 : index
      %c0_24 = arith.constant 0 : index
      %41 = vector.load %arg6[%c0_22, %c0_23, %c0_24] : memref<1x2x1xf32, #tpu.memory_space<vmem>>, vector<1x2x1xf32>
      tpu.vector_store %arg6[%c0_22, %c0_23, %c0_24], %40 {strides = array<i32>} : memref<1x2x1xf32, #tpu.memory_space<vmem>>, vector<1x2x1xf32>,
      %cst_25 = arith.constant 0.000000e+00 : f32
      %42 = vector.broadcast %cst_25 : f32 to vector<1x2x1xf32>
      %c0_26 = arith.constant 0 : index
      %c0_27 = arith.constant 0 : index
      %c0_28 = arith.constant 0 : index
      %43 = vector.load %arg7[%c0_26, %c0_27, %c0_28] : memref<1x2x1xf32, #tpu.memory_space<vmem>>, vector<1x2x1xf32>
      tpu.vector_store %arg7[%c0_26, %c0_27, %c0_28], %42 {strides = array<i32>} : memref<1x2x1xf32, #tpu.memory_space<vmem>>, vector<1x2x1xf32>,
    } else {
    }
    %c1_i32 = arith.constant 1 : i32
    %3 = arith.muli %arg0, %c1_i32 : i32
    %4 = arith.addi %3, %arg1 : i32
    %c128_i32 = arith.constant 128 : i32
    %5 = arith.muli %4, %c128_i32 : i32
    %6 = tpu.iota {dimensions = array<i32: 1>} : vector<1x128xi32>
    %7 = vector.broadcast %5 : i32 to vector<1x128xi32>
    %8 = arith.addi %7, %6 : vector<1x128xi32>
    %c0 = arith.constant 0 : index
    %9 = memref.load %arg2[%c0] : memref<1xi32, #tpu.memory_space<smem>>
    %10 = vector.broadcast %9 : i32 to vector<1x128xi32>
    %11 = arith.cmpi slt, %8, %10 : vector<1x128xi32>
    %c0_1 = arith.constant 0 : index
    %c0_2 = arith.constant 0 : index
    %12 = vector.load %arg5[%c0_1, %c0_2] : memref<2x128xbf16, #tpu.memory_space<vmem>>, vector<2x128xbf16>
    %13 = arith.extf %12 : vector<2x128xbf16> to vector<2x128xf32>
    %cst = arith.constant 0.000000e+00 : f32
    %14 = vector.shape_cast %11 : vector<1x128xi1> to vector<1x128xi1>
    %15 = vector.broadcast %14 : vector<1x128xi1> to vector<2x128xi1>
    %16 = vector.broadcast %cst : f32 to vector<2x128xf32>
    %17 = arith.select %15, %13, %16 : vector<2x128xi1>, vector<2x128xf32>
    %c0_3 = arith.constant 0 : index
    %c0_4 = arith.constant 0 : index
    %18 = vector.load %arg4[%c0_3, %c0_4] : memref<1x128xf32, #tpu.memory_space<vmem>>, vector<1x128xf32>
    %c0_5 = arith.constant 0 : index
    %19 = memref.load %arg3[%c0_5] : memref<1xf32, #tpu.memory_space<smem>>
    %20 = vector.broadcast %19 : f32 to vector<1x128xf32>
    %21 = arith.cmpf oge, %18, %20 : vector<1x128xf32>
    %22 = arith.extui %21 : vector<1x128xi1> to vector<1x128xi32>
    %23 = arith.sitofp %22 : vector<1x128xi32> to vector<1x128xf32>
    %cst_6 = arith.constant 0.000000e+00 : f32
    %24 = vector.broadcast %cst_6 : f32 to vector<1x128xf32>
    %25 = arith.select %11, %23, %24 : vector<1x128xi1>, vector<1x128xf32>
    %26 = vector.broadcast %25 : vector<1x128xf32> to vector<2x128xf32>
    %27 = arith.mulf %17, %26 : vector<2x128xf32>
    %cst_7 = arith.constant dense<0.000000e+00> : vector<2xf32>
    %28 = vector.multi_reduction <add>, %27, %cst_7 [1] : vector<2x128xf32> to vector<2xf32>
    %29 = vector.shape_cast %28 : vector<2xf32> to vector<2x1xf32>
    %cst_8 = arith.constant dense<0.000000e+00> : vector<2xf32>
    %30 = vector.multi_reduction <add>, %17, %cst_8 [1] : vector<2x128xf32> to vector<2xf32>
    %31 = vector.shape_cast %30 : vector<2xf32> to vector<2x1xf32>
    %c0_9 = arith.constant 0 : index
    %c0_10 = arith.constant 0 : index
    %c0_11 = arith.constant 0 : index
    %32 = vector.load %arg6[%c0_9, %c0_10, %c0_11] : memref<1x2x1xf32, #tpu.memory_space<vmem>>, vector<1x2x1xf32>
    %33 = vector.shape_cast %29 : vector<2x1xf32> to vector<1x2x1xf32>
    %34 = arith.addf %32, %33 : vector<1x2x1xf32>
    %c0_12 = arith.constant 0 : index
    %c0_13 = arith.constant 0 : index
    %c0_14 = arith.constant 0 : index
    %35 = vector.load %arg6[%c0_12, %c0_13, %c0_14] : memref<1x2x1xf32, #tpu.memory_space<vmem>>, vector<1x2x1xf32>
    tpu.vector_store %arg6[%c0_12, %c0_13, %c0_14], %34 {strides = array<i32>} : memref<1x2x1xf32, #tpu.memory_space<vmem>>, vector<1x2x1xf32>,
    %c0_15 = arith.constant 0 : index
    %c0_16 = arith.constant 0 : index
    %c0_17 = arith.constant 0 : index
    %36 = vector.load %arg7[%c0_15, %c0_16, %c0_17] : memref<1x2x1xf32, #tpu.memory_space<vmem>>, vector<1x2x1xf32>
    %37 = vector.shape_cast %31 : vector<2x1xf32> to vector<1x2x1xf32>
    %38 = arith.addf %36, %37 : vector<1x2x1xf32>
    %c0_18 = arith.constant 0 : index
    %c0_19 = arith.constant 0 : index
    %c0_20 = arith.constant 0 : index
    %39 = vector.load %arg7[%c0_18, %c0_19, %c0_20] : memref<1x2x1xf32, #tpu.memory_space<vmem>>, vector<1x2x1xf32>
    tpu.vector_store %arg7[%c0_18, %c0_19, %c0_20], %38 {strides = array<i32>} : memref<1x2x1xf32, #tpu.memory_space<vmem>>, vector<1x2x1xf32>,
    return
  }
  func.func @transform_0(%arg0: i32, %arg1: i32) -> i32 {
    %c0_i32 = arith.constant 0 : i32
    %c0_i32_0 = arith.constant 0 : i32
    return %c0_i32 : i32
  }
  func.func @transform_1(%arg0: i32, %arg1: i32) -> i32 {
    %c0_i32 = arith.constant 0 : i32
    %c0_i32_0 = arith.constant 0 : i32
    return %c0_i32 : i32
  }
  func.func @transform_2(%arg0: i32, %arg1: i32) -> (i32, i32) {
    %c1_i32 = arith.constant 1 : i32
    %0 = arith.muli %arg0, %c1_i32 : i32
    %1 = arith.addi %0, %arg1 : i32
    %c0_i32 = arith.constant 0 : i32
    %2 = arith.minsi %1, %c0_i32 : i32
    %c0_i32_0 = arith.constant 0 : i32
    %c0_i32_1 = arith.constant 0 : i32
    return %c0_i32_0, %2 : i32, i32
  }
  func.func @transform_3(%arg0: i32, %arg1: i32) -> (i32, i32) {
    %c1_i32 = arith.constant 1 : i32
    %0 = arith.muli %arg0, %c1_i32 : i32
    %1 = arith.addi %0, %arg1 : i32
    %c0_i32 = arith.constant 0 : i32
    %2 = arith.minsi %1, %c0_i32 : i32
    %c0_i32_0 = arith.constant 0 : i32
    %c0_i32_1 = arith.constant 0 : i32
    return %c0_i32_0, %2 : i32, i32
  }
  func.func @transform_4(%arg0: i32, %arg1: i32) -> (i32, i32, i32) {
    %c0_i32 = arith.constant 0 : i32
    %c0_i32_0 = arith.constant 0 : i32
    %c0_i32_1 = arith.constant 0 : i32
    return %arg0, %c0_i32, %c0_i32_0 : i32, i32, i32
  }
  func.func @transform_5(%arg0: i32, %arg1: i32) -> (i32, i32, i32) {
    %c0_i32 = arith.constant 0 : i32
    %c0_i32_0 = arith.constant 0 : i32
    %c0_i32_1 = arith.constant 0 : i32
    return %arg0, %c0_i32, %c0_i32_0 : i32, i32, i32
  }
}

</mosaic_0001>

<bundles_post_ra>
// kernel: tpu_custom_call.1
= control target key start
LH: loop header
LB: loop body
LE: loop exit
PB: predicated region body
PF: predicated region fallthrough
CT: control target
= control target key end

     0   :  { %v78_v0 = vlaneseq  ;;  %vm73_vm0 = vcmask 1024   ;;  %v132_v5 = vmov 0.0   ;;  %vm102_vm3 = vcmask 1041408   ;;  %s197_s0 = inlined_call_operand.<no memory space> [shape: s32[1], index: 0, kind: input, shape index: {}]   ;;  %s198_s1 = inlined_call_operand.<no memory space> [shape: f32[1], index: 1, kind: input, shape index: {}]   ;;  %s199_s2 = inlined_call_operand.vmem [shape: f32[1,4], index: 2, kind: input, shape index: {}]   ;;  %s200_s3 = inlined_call_operand.vmem [shape: bf16[2,4], index: 3, kind: input, shape index: {}]   ;;  %s201_s4 = inlined_call_operand.vmem [shape: f32[1,2,1], index: 4, kind: output, shape index: {0}]   ;;  %s202_s5 = inlined_call_operand.vmem [shape: f32[1,2,1], index: 5, kind: output, shape index: {1}]  }
   0x1   :  { %v83_v1 = vstv %s197_s0  ;;  %v85_v2 = vld [vmem:[%s200_s3] sm:$0x1]  ;;  %v92_v4 = vstv %s198_s1  ;;  %74 = vst.msk [vmem:[%s201_s4] sm:$0x3] %vm73_vm0, %v132_v5 }
   0x2   :  { %v90_v3 = vld [vmem:[%s199_s2] sm:$0x1]  ;;  %v79_v6 = vand.u32 127, %v78_v0  ;;  %v86_v7 = vunpack.c.l.bf16 %v85_v2  ;;  %v98_v8 = vshrl.u32 %v78_v0, 7  ;;  %75 = vst.msk [vmem:[%s202_s5] sm:$0x3] %vm73_vm0, %v132_v5 }
   0x3   :  { %vm93_vm1 = vcmp.ge.f32.partialorder %v90_v3, %v92_v4 }
   0x4   :  { %v130_v9 = vsel %vm93_vm1, 1.0, %v132_v5  ;;  %vm84_vm2 = vcmp.lt.s32.totalorder %v79_v6, %v83_v1  ;;  %v99_v10 = vsub.s32 0, %v98_v8 }
   0x5   :  { %v89_v11 = vsel %vm84_vm2, %v86_v7, 0.0  ;;  %v96_v12 = vsel %vm84_vm2, %v130_v9, 0.0 }
   0x6   :  { %v100_v13 = vrot.slane %v96_v12, %v99_v10  ;;  %v106_v16 = vsel %vm102_vm3, %v89_v11, 0.0 }
   0x8   :  { %v101_v14 = vmul.f32 %v100_v13, %v89_v11  ;;  %v109_v17 = vld [vmem:[%s201_s4] sm:$0x3] }
   0x9   :  { %v113_v20 = vld [vmem:[%s202_s5] sm:$0x3] }
   0xa   :  { %v103_v15 = vsel %vm102_vm3, %v101_v14, 0.0 }
   0xb   :  { %104 = vadd.xlane.f32.xlu0 %v103_v15 }
   0xf   :  { %107 = vadd.xlane.f32.xlu0 %v106_v16 }
  0x98   :  { %v105_v18 = vpop.xlane.xlu0 %104 }
  0x99   :  { %v110_v19 = vadd.f32 %v109_v17, %v105_v18 }
  0x9b   :  { %112 = vst.msk [vmem:[%s201_s4] sm:$0x3] %vm73_vm0, %v110_v19 }
  0x9c   :  { %v108_v21 = vpop.xlane.xlu0 %107 }
  0x9d   :  { %v114_v22 = vadd.f32 %v113_v20, %v108_v21 }
  0x9f   :  { %115 = vst.msk [vmem:[%s202_s5] sm:$0x3] %vm73_vm0, %v114_v22 }

</bundles_post_ra>
